<compile_context>
chip_gen: v7x
topology: tpu7x:2x2x1
jax: 0.10.0
libtpu: 0.0.40
codegen_flags: <defaults>
</compile_context>

<pallas_src>
import math
from functools import partial

import jax
import jax.numpy as jnp
import numpy as np
from jax.experimental import pallas as pl
from jax.experimental.pallas import tpu as pltpu


def _resident_spec(block_shape, index_map):
    """BlockSpec for operands whose block never changes: single-buffer them."""
    try:
        return pl.BlockSpec(block_shape, index_map, pipeline_mode=pl.Buffered(1))
    except TypeError:  # older jax without pipeline_mode: fall back to default buffering
        return pl.BlockSpec(block_shape, index_map)


def _default_vmem_limit_bytes():
    """~96 MiB on 128-MiB parts (v5e/v6e), ~48 MiB on 64-MiB parts (v7x)."""
    try:
        cap = int(pltpu.get_tpu_info().vmem_capacity_bytes)
    except Exception:
        cap = 64 * 1024 * 1024
    return max(32 * 1024 * 1024, min(cap - 16 * 1024 * 1024, 96 * 1024 * 1024))


# ---------------------------------------------------------------------------
# Pass 1: RMSNorm + fused QKV projection.
#   grid = (batch, seq_tile).  One wide matmul per tile; per-head relayout is a
#   handful of static lane slices.  K and V are packed per head as [k_h | v_h]
#   (2*d_kv = 128 lanes) so the cache store and the pass-2 stream are lane-dense.
# ---------------------------------------------------------------------------
def _t5_proj_kernel(x_ref, lnw_ref, wqkv_ref, q_ref, kv_ref, *,
                    n_heads, d_kv, eps, sm_scale):
    inner = n_heads * d_kv

    xf = x_ref[0].astype(jnp.float32)                              # (pt, D)
    var = jnp.mean(xf * xf, axis=-1, keepdims=True)
    xn = (lnw_ref[...] * (xf * jax.lax.rsqrt(var + eps))).astype(wqkv_ref.dtype)

    # Single lane-dense matmul: (pt, D) @ (D, 3*inner) -> (pt, 3*inner) f32.
    qkv = jnp.dot(xn, wqkv_ref[...], preferred_element_type=jnp.float32)

    # Fold the softmax scale into Q once (O(S*inner) multiplies instead of O(S^2*H)).
    q_all = (qkv[:, :inner] * sm_scale).astype(q_ref.dtype)        # (pt, inner)
    kv_all = qkv[:, inner:].astype(kv_ref.dtype)                   # (pt, 2*inner), per-head [k|v]

    for h in range(n_heads):                                       # static, unrolled
        q_ref[0, h] = q_all[:, h * d_kv:(h + 1) * d_kv]            # (pt, Dk)
        kv_ref[0, h] = kv_all[:, 2 * h * d_kv:2 * (h + 1) * d_kv]  # (pt, 2*Dk) lane-dense


# ---------------------------------------------------------------------------
# Pass 2: flash attention (online softmax) + output projection + residual.
#   grid = (batch, q_tile, kv_tile); kv axis is the innermost reduction.
#   K/V tiles are streamed (double-buffered) from HBM -> VMEM stays O(tile).
# ---------------------------------------------------------------------------
def _t5_attn_kernel(x_ref, q_ref, kv_ref, wo_ref, o_ref,
                    m_scr, l_scr, acc_scr, *, n_heads, d_kv):
    ki = pl.program_id(2)
    nk = pl.num_programs(2)

    @pl.when(ki == 0)
    def _():
        m_scr[...] = jnp.full(m_scr.shape, -jnp.inf, dtype=m_scr.dtype)
        l_scr[...] = jnp.zeros(l_scr.shape, dtype=l_scr.dtype)
        acc_scr[...] = jnp.zeros(acc_scr.shape, dtype=acc_scr.dtype)

    q = q_ref[0]                                                   # (H, tq, Dk) bf16 (pre-scaled)
    kv = kv_ref[0]                                                 # (H, tk, 2*Dk) bf16
    k = kv[:, :, :d_kv]
    v = kv[:, :, d_kv:]

    s = jnp.einsum('hqd,hkd->hqk', q, k,
                   preferred_element_type=jnp.float32)             # (H, tq, tk) f32
    m_prev = m_scr[...]
    m_new = jnp.maximum(m_prev, jnp.max(s, axis=-1, keepdims=True))
    alpha = jnp.exp(m_prev - m_new)
    p = jnp.exp(s - m_new)
    l_scr[...] = alpha * l_scr[...] + jnp.sum(p, axis=-1, keepdims=True)
    acc_scr[...] = alpha * acc_scr[...] + jnp.einsum(
        'hqk,hkd->hqd', p.astype(v.dtype), v, preferred_element_type=jnp.float32)
    m_scr[...] = m_new

    # Last kv tile: normalize, project heads (accumulate in MXU), add residual.
    @pl.when(ki == nk - 1)
    def _():
        attn = (acc_scr[...] * pl.reciprocal(l_scr[...], approx=True)).astype(wo_ref.dtype)
        out = x_ref[0].astype(jnp.float32)                         # residual (tq, D)
        for h in range(n_heads):                                   # per-head N=D lane-dense dots
            out = out + jnp.dot(attn[h], wo_ref[h],
                                preferred_element_type=jnp.float32)
        o_ref[0] = out.astype(o_ref.dtype)


def flash_t5_layer_self_attention(hidden_states, ln_weight, wq, wk, wv, wo, *,
                                  n_heads, d_kv, eps=1e-6, sm_scale=None,
                                  q_tile=256, kv_tile=256, proj_tile=256,
                                  vmem_limit_bytes=None):
    """hidden_states: (B, S, D); ln_weight: (D,); wq/wk/wv: (D, H*Dk); wo: (H*Dk, D).

    Weights may be bf16 (recommended).  Defaults of 256 fill the 256-wide MXU on
    v6e/v7x; on v5e prefer q_tile=kv_tile=128 (its MXU is 128-wide) and spend the
    spare VMEM on pipelining instead.  hidden_states may also be bf16 to halve
    activation HBM traffic (RMSNorm / softmax / residual still run in f32).
    """
    B, S, D = hidden_states.shape
    inner = n_heads * d_kv
    assert wq.shape == (D, inner) and wk.shape == (D, inner) and wv.shape == (D, inner)
    assert wo.shape == (inner, D)

    q_tile = min(q_tile, S)
    kv_tile = min(kv_tile, S)
    proj_tile = min(proj_tile, S)
    assert S % q_tile == 0 and S % kv_tile == 0 and S % proj_tile == 0, \
        "S must be divisible by the tile sizes"
    assert q_tile % 8 == 0 and kv_tile % 8 == 0 and proj_tile % 8 == 0
    nq, nk, nt = S // q_tile, S // kv_tile, S // proj_tile

    if sm_scale is None:
        sm_scale = 1.0 / math.sqrt(n_heads)   # FlashT5Attention default (attention_scale=None)
    if vmem_limit_bytes is None:
        vmem_limit_bytes = _default_vmem_limit_bytes()

    # One-time weight re-layouts (would be stored pre-laid-out in a real model):
    #   Wqkv fused -> (D, 3*inner), columns = [ Wq | per-head (Wk_h | Wv_h) ]
    #   Wo         -> (H, Dk, D)
    wkv_fused = jnp.concatenate(
        [wk.reshape(D, n_heads, d_kv), wv.reshape(D, n_heads, d_kv)], axis=-1
    ).reshape(D, 2 * inner)
    wqkv = jnp.concatenate([wq, wkv_fused], axis=-1).astype(jnp.bfloat16)   # (D, 3*inner)
    wo_h = wo.reshape(n_heads, d_kv, D).astype(jnp.bfloat16)
    ln2d = ln_weight.reshape(1, D).astype(jnp.float32)

    # ---------------- Pass 1: RMSNorm + fused QKV projection ----------------
    proj_kernel = partial(_t5_proj_kernel, n_heads=n_heads, d_kv=d_kv,
                          eps=eps, sm_scale=sm_scale)
    q_proj, kv_proj = pl.pallas_call(
        proj_kernel,
        out_shape=(
            jax.ShapeDtypeStruct((B, n_heads, S, d_kv), jnp.bfloat16),       # scaled Q
            jax.ShapeDtypeStruct((B, n_heads, S, 2 * d_kv), jnp.bfloat16),   # fused [K|V]
        ),
        grid=(B, nt),
        in_specs=[
            pl.BlockSpec((1, proj_tile, D), lambda b, t: (b, t, 0)),         # x
            _resident_spec((1, D), lambda b, t: (0, 0)),                     # RMSNorm weight
            _resident_spec((D, 3 * inner), lambda b, t: (0, 0)),             # fused Wqkv
        ],
        out_specs=(
            pl.BlockSpec((1, n_heads, proj_tile, d_kv), lambda b, t: (b, 0, t, 0)),
            pl.BlockSpec((1, n_heads, proj_tile, 2 * d_kv), lambda b, t: (b, 0, t, 0)),
        ),
        compiler_params=pltpu.CompilerParams(
            dimension_semantics=("parallel", "parallel"),
            vmem_limit_bytes=vmem_limit_bytes,
        ),
    )(hidden_states, ln2d, wqkv)

    # ------------- Pass 2: flash attention + O-projection + residual --------
    attn_kernel = partial(_t5_attn_kernel, n_heads=n_heads, d_kv=d_kv)
    out = pl.pallas_call(
        attn_kernel,
        out_shape=jax.ShapeDtypeStruct((B, S, D), hidden_states.dtype),
        grid=(B, nq, nk),
        in_specs=[
            pl.BlockSpec((1, q_tile, D), lambda b, qi, ki: (b, qi, 0)),            # residual x
            pl.BlockSpec((1, n_heads, q_tile, d_kv), lambda b, qi, ki: (b, 0, qi, 0)),      # Q
            pl.BlockSpec((1, n_heads, kv_tile, 2 * d_kv), lambda b, qi, ki: (b, 0, ki, 0)), # K|V (streamed)
            _resident_spec((n_heads, d_kv, D), lambda b, qi, ki: (0, 0, 0)),       # Wo
        ],
        out_specs=pl.BlockSpec((1, q_tile, D), lambda b, qi, ki: (b, qi, 0)),
        scratch_shapes=[
            pltpu.VMEM((n_heads, q_tile, 1), jnp.float32),      # m (running max)
            pltpu.VMEM((n_heads, q_tile, 1), jnp.float32),      # l (running denom)
            pltpu.VMEM((n_heads, q_tile, d_kv), jnp.float32),   # acc
        ],
        compiler_params=pltpu.CompilerParams(
            # No cross-q-tile state anymore -> q axis can be parallel (v7x dual-TC).
            dimension_semantics=("parallel", "parallel", "arbitrary"),
            vmem_limit_bytes=vmem_limit_bytes,
        ),
    )(hidden_states, q_proj, kv_proj, wo_h)

    return out


def _reference(x, ln_w, wq, wk, wv, wo, *, n_heads, d_kv, eps, sm_scale):
    """Pure-JAX f32 reference mirroring the PyTorch forward pass."""
    B, S, D = x.shape
    xf = x.astype(jnp.float32)
    var = jnp.mean(xf * xf, axis=-1, keepdims=True)
    normed = ln_w.astype(jnp.float32) * (xf * jax.lax.rsqrt(var + eps))
    wq32, wk32, wv32, wo32 = (w.astype(jnp.float32) for w in (wq, wk, wv, wo))
    q = (normed @ wq32).reshape(B, S, n_heads, d_kv)
    k = (normed @ wk32).reshape(B, S, n_heads, d_kv)
    v = (normed @ wv32).reshape(B, S, n_heads, d_kv)
    s = jnp.einsum('bqhd,bkhd->bhqk', q, k) * sm_scale
    p = jax.nn.softmax(s, axis=-1)
    attn = jnp.einsum('bhqk,bkhd->bqhd', p, v).reshape(B, S, n_heads * d_kv)
    return xf + attn @ wo32


if __name__ == "__main__":
    # Small, module-consistent config: d_model=128, num_heads=2, d_kv=64, seq=256, batch=2.
    # Tiles of 128 exercise the (batch, q-tile, kv-tile) grid, the online softmax and
    # the streamed (double-buffered) K/V path.
    B, S, D = 2, 256, 128
    H, DK = 2, 64
    INNER = H * DK
    EPS = 1e-6
    SM_SCALE = 1.0 / math.sqrt(H)   # module default: 1/sqrt(n_heads)

    key = jax.random.PRNGKey(0)
    kx, kq, kk, kv, ko = jax.random.split(key, 5)

    hidden_states = jax.random.normal(kx, (B, S, D), dtype=jnp.float32)
    ln_weight = jnp.ones((D,), dtype=jnp.float32)   # nn.Parameter(torch.ones(hidden_size))
    wq = (0.02 * jax.random.normal(kq, (D, INNER), dtype=jnp.float32)).astype(jnp.bfloat16)
    wk = (0.02 * jax.random.normal(kk, (D, INNER), dtype=jnp.float32)).astype(jnp.bfloat16)
    wv = (0.02 * jax.random.normal(kv, (D, INNER), dtype=jnp.float32)).astype(jnp.bfloat16)
    wo = (0.02 * jax.random.normal(ko, (INNER, D), dtype=jnp.float32)).astype(jnp.bfloat16)

    out = flash_t5_layer_self_attention(hidden_states, ln_weight, wq, wk, wv, wo,
                                        n_heads=H, d_kv=DK, eps=EPS,
                                        q_tile=128, kv_tile=128, proj_tile=128)
    out = jax.block_until_ready(out)

    ref = _reference(hidden_states, ln_weight, wq, wk, wv, wo,
                     n_heads=H, d_kv=DK, eps=EPS, sm_scale=SM_SCALE)
    np.testing.assert_allclose(np.asarray(out), np.asarray(ref), rtol=2e-2, atol=2e-2)

    # The module also returns position_bias; with pe_encoding=None it is None.
    print("KERNEL_OK")
</pallas_src>

<mosaic_0001>
module attributes {stable_mosaic.version = 11 : i64} {
  func.func @_t5_proj_kernel(%arg0: i32, %arg1: i32, %arg2: memref<1x128x128xf32, #tpu.memory_space<vmem>>, %arg3: memref<1x128xf32, #tpu.memory_space<vmem>>, %arg4: memref<128x384xbf16, #tpu.memory_space<vmem>>, %arg5: memref<1x2x128x64xbf16, #tpu.memory_space<vmem>>, %arg6: memref<1x2x128x128xbf16, #tpu.memory_space<vmem>>) attributes {dimension_semantics = [#tpu.dimension_semantics<parallel>, #tpu.dimension_semantics<parallel>], iteration_bounds = array<i64: 2, 2>, scalar_prefetch = 0 : i64, scratch_operands = 0 : i64, tpu.core_type = #tpu.core_type<tc>, window_params = [{transform_indices = @transform_0, window_bounds = array<i64: 1, 128, 128>}, {pipeline_mode = #tpu.pipeline_mode<synchronous>, transform_indices = @transform_1, window_bounds = array<i64: 1, 128>}, {pipeline_mode = #tpu.pipeline_mode<synchronous>, transform_indices = @transform_2, window_bounds = array<i64: 128, 384>}, {transform_indices = @transform_3, window_bounds = array<i64: 1, 2, 128, 64>}, {transform_indices = @transform_4, window_bounds = array<i64: 1, 2, 128, 128>}]} {
    %c0 = arith.constant 0 : index
    %c0_0 = arith.constant 0 : index
    %c0_1 = arith.constant 0 : index
    %0 = vector.load %arg2[%c0, %c0_0, %c0_1] : memref<1x128x128xf32, #tpu.memory_space<vmem>>, vector<1x128x128xf32>
    %1 = vector.shape_cast %0 : vector<1x128x128xf32> to vector<128x128xf32>
    %2 = arith.mulf %1, %1 : vector<128x128xf32>
    %cst = arith.constant dense<0.000000e+00> : vector<128xf32>
    %3 = vector.multi_reduction <add>, %2, %cst [1] : vector<128x128xf32> to vector<128xf32>
    %4 = vector.shape_cast %3 : vector<128xf32> to vector<128x1xf32>
    %cst_2 = arith.constant 1.280000e+02 : f32
    %5 = vector.broadcast %cst_2 : f32 to vector<128x1xf32>
    %6 = arith.divf %4, %5 : vector<128x1xf32>
    %c0_3 = arith.constant 0 : index
    %c0_4 = arith.constant 0 : index
    %7 = vector.load %arg3[%c0_3, %c0_4] : memref<1x128xf32, #tpu.memory_space<vmem>>, vector<1x128xf32>
    %cst_5 = arith.constant 9.99999997E-7 : f32
    %8 = vector.broadcast %cst_5 : f32 to vector<128x1xf32>
    %9 = arith.addf %6, %8 : vector<128x1xf32>
    %10 = math.rsqrt %9 : vector<128x1xf32>
    %11 = vector.broadcast %10 : vector<128x1xf32> to vector<128x128xf32>
    %12 = arith.mulf %1, %11 : vector<128x128xf32>
    %13 = vector.broadcast %7 : vector<1x128xf32> to vector<128x128xf32>
    %14 = arith.mulf %13, %12 : vector<128x128xf32>
    %15 = arith.truncf %14 : vector<128x128xf32> to vector<128x128xbf16>
    %c0_6 = arith.constant 0 : index
    %c0_7 = arith.constant 0 : index
    %16 = vector.load %arg4[%c0_6, %c0_7] : memref<128x384xbf16, #tpu.memory_space<vmem>>, vector<128x384xbf16>
    %cst_8 = arith.constant dense<0.000000e+00> : vector<128x384xf32>
    %17 = tpu.matmul %15, %16, %cst_8 {dimension_numbers = #tpu.dot_dimension_numbers<[1], [0], [0], [1], [0, 0, 1, 1], [], []>} : vector<128x128xbf16>, vector<128x384xbf16>, vector<128x384xf32> -> vector<128x384xf32>
    %18 = vector.extract_strided_slice %17 {offsets = [0, 0], sizes = [128, 128], strides = [1, 1]} : vector<128x384xf32> to vector<128x128xf32>
    %cst_9 = arith.constant 0.707106769 : f32
    %19 = vector.broadcast %cst_9 : f32 to vector<128x128xf32>
    %20 = arith.mulf %18, %19 : vector<128x128xf32>
    %21 = arith.truncf %20 : vector<128x128xf32> to vector<128x128xbf16>
    %22 = vector.extract_strided_slice %17 {offsets = [0, 128], sizes = [128, 256], strides = [1, 1]} : vector<128x384xf32> to vector<128x256xf32>
    %23 = arith.truncf %22 : vector<128x256xf32> to vector<128x256xbf16>
    %24 = vector.extract_strided_slice %21 {offsets = [0, 0], sizes = [128, 64], strides = [1, 1]} : vector<128x128xbf16> to vector<128x64xbf16>
    %c0_10 = arith.constant 0 : index
    %c0_11 = arith.constant 0 : index
    %c0_12 = arith.constant 0 : index
    %c0_13 = arith.constant 0 : index
    %25 = vector.load %arg5[%c0_10, %c0_11, %c0_12, %c0_13] : memref<1x2x128x64xbf16, #tpu.memory_space<vmem>>, vector<1x1x128x64xbf16>
    %26 = vector.shape_cast %25 : vector<1x1x128x64xbf16> to vector<128x64xbf16>
    %27 = vector.shape_cast %24 : vector<128x64xbf16> to vector<1x1x128x64xbf16>
    tpu.vector_store %arg5[%c0_10, %c0_11, %c0_12, %c0_13], %27 {strides = array<i32>} : memref<1x2x128x64xbf16, #tpu.memory_space<vmem>>, vector<1x1x128x64xbf16>,
    %28 = vector.extract_strided_slice %23 {offsets = [0, 0], sizes = [128, 128], strides = [1, 1]} : vector<128x256xbf16> to vector<128x128xbf16>
    %c0_14 = arith.constant 0 : index
    %c0_15 = arith.constant 0 : index
    %c0_16 = arith.constant 0 : index
    %c0_17 = arith.constant 0 : index
    %29 = vector.load %arg6[%c0_14, %c0_15, %c0_16, %c0_17] : memref<1x2x128x128xbf16, #tpu.memory_space<vmem>>, vector<1x1x128x128xbf16>
    %30 = vector.shape_cast %29 : vector<1x1x128x128xbf16> to vector<128x128xbf16>
    %31 = vector.shape_cast %28 : vector<128x128xbf16> to vector<1x1x128x128xbf16>
    tpu.vector_store %arg6[%c0_14, %c0_15, %c0_16, %c0_17], %31 {strides = array<i32>} : memref<1x2x128x128xbf16, #tpu.memory_space<vmem>>, vector<1x1x128x128xbf16>,
    %32 = vector.extract_strided_slice %21 {offsets = [0, 64], sizes = [128, 64], strides = [1, 1]} : vector<128x128xbf16> to vector<128x64xbf16>
    %c0_18 = arith.constant 0 : index
    %c1 = arith.constant 1 : index
    %c0_19 = arith.constant 0 : index
    %c0_20 = arith.constant 0 : index
    %33 = vector.load %arg5[%c0_18, %c1, %c0_19, %c0_20] : memref<1x2x128x64xbf16, #tpu.memory_space<vmem>>, vector<1x1x128x64xbf16>
    %34 = vector.shape_cast %33 : vector<1x1x128x64xbf16> to vector<128x64xbf16>
    %35 = vector.shape_cast %32 : vector<128x64xbf16> to vector<1x1x128x64xbf16>
    tpu.vector_store %arg5[%c0_18, %c1, %c0_19, %c0_20], %35 {strides = array<i32>} : memref<1x2x128x64xbf16, #tpu.memory_space<vmem>>, vector<1x1x128x64xbf16>,
    %36 = vector.extract_strided_slice %23 {offsets = [0, 128], sizes = [128, 128], strides = [1, 1]} : vector<128x256xbf16> to vector<128x128xbf16>
    %c0_21 = arith.constant 0 : index
    %c1_22 = arith.constant 1 : index
    %c0_23 = arith.constant 0 : index
    %c0_24 = arith.constant 0 : index
    %37 = vector.load %arg6[%c0_21, %c1_22, %c0_23, %c0_24] : memref<1x2x128x128xbf16, #tpu.memory_space<vmem>>, vector<1x1x128x128xbf16>
    %38 = vector.shape_cast %37 : vector<1x1x128x128xbf16> to vector<128x128xbf16>
    %39 = vector.shape_cast %36 : vector<128x128xbf16> to vector<1x1x128x128xbf16>
    tpu.vector_store %arg6[%c0_21, %c1_22, %c0_23, %c0_24], %39 {strides = array<i32>} : memref<1x2x128x128xbf16, #tpu.memory_space<vmem>>, vector<1x1x128x128xbf16>,
    return
  }
  func.func @transform_0(%arg0: i32, %arg1: i32) -> (i32, i32, i32) {
    %c0_i32 = arith.constant 0 : i32
    %c0_i32_0 = arith.constant 0 : i32
    return %arg0, %arg1, %c0_i32 : i32, i32, i32
  }
  func.func @transform_1(%arg0: i32, %arg1: i32) -> (i32, i32) {
    %c0_i32 = arith.constant 0 : i32
    %c0_i32_0 = arith.constant 0 : i32
    %c0_i32_1 = arith.constant 0 : i32
    return %c0_i32, %c0_i32_0 : i32, i32
  }
  func.func @transform_2(%arg0: i32, %arg1: i32) -> (i32, i32) {
    %c0_i32 = arith.constant 0 : i32
    %c0_i32_0 = arith.constant 0 : i32
    %c0_i32_1 = arith.constant 0 : i32
    return %c0_i32, %c0_i32_0 : i32, i32
  }
  func.func @transform_3(%arg0: i32, %arg1: i32) -> (i32, i32, i32, i32) {
    %c0_i32 = arith.constant 0 : i32
    %c0_i32_0 = arith.constant 0 : i32
    %c0_i32_1 = arith.constant 0 : i32
    return %arg0, %c0_i32, %arg1, %c0_i32_0 : i32, i32, i32, i32
  }
  func.func @transform_4(%arg0: i32, %arg1: i32) -> (i32, i32, i32, i32) {
    %c0_i32 = arith.constant 0 : i32
    %c0_i32_0 = arith.constant 0 : i32
    %c0_i32_1 = arith.constant 0 : i32
    return %arg0, %c0_i32, %arg1, %c0_i32_0 : i32, i32, i32, i32
  }
}

</mosaic_0001>

<bundles_post_ra>
// kernel: tpu_custom_call.1
= control target key start
LH: loop header
LB: loop body
LE: loop exit
PB: predicated region body
PF: predicated region fallthrough
CT: control target
= control target key end

     0   :  { %s2620_s0 = inlined_call_operand.hbm [shape: f32[2,256,128], index: 0, kind: input, shape index: {}]   ;;  %s2621_s1 = inlined_call_operand.vmem [shape: f32[1,128], index: 1, kind: input, shape index: {}]   ;;  %s2622_s2 = inlined_call_operand.hbm [shape: bf16[128,384], index: 2, kind: input, shape index: {}]   ;;  %s2623_s3 = inlined_call_operand.vmem [shape: bf16[2,2,256,64], index: 3, kind: output, shape index: {0}]   ;;  %s2624_s4 = inlined_call_operand.hbm [shape: bf16[2,2,256,128], index: 4, kind: output, shape index: {1}]  }
   0x1   :  { %2634 = sst [smem:[#allocation19_spill]] %s2622_s2 }
   0x2   :  { %10 = vsyncpa [#allocation3], 0 }
   0x3   :  { %12 = vsyncpa [#allocation3 + $0x1], 0 }
   0x4   :  { %13 = vsyncpa [#allocation6], 0 }
   0x5   :  { %14 = vsyncpa [#allocation4], 0 }
   0x6   :  { %16 = vsyncpa [#allocation4 + $0x1], 0  ;;  %s2132_s15 = smov 0   ;;  %s2134_s16 = smov 0  }
   0x7   :  { %s2136_s17 = smov 0   ;;  %s2138_s18 = smov 0  }
   0x8   :  { %s2140_s19 = smov 0   ;;  %s2142_s20 = smov 0  }
   0x9   :  { %s2144_s21 = smov 0   ;;  %s2146_s22 = smov 0  }
   0xa LB: > { %2635 = sst [smem:[#allocation14_spill]] %s2062_s15  ;;  %s1466_s23 = sadd.s32 4294967295, %s2090_s22   ;;  %s2090_s22 = sphi %s2146_s22, %s22_s22   ;;  %s2086_s21 = sphi %s2144_s21, %s2664_s21   ;;  %s2082_s20 = sphi %s2142_s20, %s2658_s20   ;;  %s2078_s19 = sphi %s2140_s19, %s2663_s19   ;;  %s2074_s18 = sphi %s2138_s18, %s2657_s18   ;;  %s2070_s17 = sphi %s2136_s17, %s2662_s17   ;;  %s2066_s16 = sphi %s2134_s16, %s2661_s16   ;;  %s2062_s15 = sphi %s2132_s15, %s2660_s15  }
   0xb   : > { %2636 = sst [smem:[#allocation15_spill]] %s2082_s20  ;;  %s1467_s24 = sadd.s32 4294967294, %s2090_s22  }
   0xc   : > { %p56_p0 = scmp.ne.s32.totalorder %s2066_s16, %s2062_s15  ;;  %p2176_p1 = scmp.eq.s32.totalorder %s1466_s23, 0 }
   0xd   : > { %p2180_p2 = scmp.eq.s32.totalorder %s1466_s23, 3  ;;  %p158_p3 = scmp.eq.s32.totalorder %s1467_s24, 3 }
   0xe   : > { %s2637_s25 = scalar_select %p2176_p1, 1, 0 }
   0xf   : > { %s2638_s26 = scalar_select %p2180_p2, 1, 0 }
  0x10   : > { %p2186_p4 = por %p2176_p1, %p56_p0  ;;  %p1468_p5 = scmp.ge.s32.totalorder %s2090_s22, 1 }
  0x11   : > { %p2191_p6 = por %p158_p3, %p56_p0  ;;  %p165_p7 = scmp.lt.s32.totalorder %s2090_s22, 5 }
  0x12   : > { %s2639_s27 = scalar_select %p2186_p4, 1, 0 }
  0x13   : > { %s2640_s28 = scalar_select %p2191_p6, 1, 0 }
  0x14   : > { %p2196_p8 = pnand %p1468_p5, %p165_p7  ;;  %s2092_s30 = smov [#allocation5]  }
  0x15   : > { %2641 = sst [smem:[#allocation16_spill]] %s2640_s28  ;;  %s180_s5 = sshll.u32 %s2092_s30, 4  ;;  %s181_s5 = int_to_ptr.vmem [resolvable:$true] %s180_s5 }
  0x16   : > { %s2642_s29 = scalar_select %p2196_p8, 1, 0 }
  0x17   : > { %p1800_p9 = pneg %p2196_p8  ;;  %s2644_s2 = sld [smem:[#allocation19_spill]] }
  0x19   : > { %p2204_p10 = pnand %p1800_p9, %p2176_p1 }
  0x1b   : > { %p1960_p12 = pneg %p2204_p10 }
  0x1d   : > { %s1958_s9 = scalar_lea.hbm %s2644_s2, 3072 }
  0x1e   : > { %p1959_p11 = scmp.ne.s32.totalorder %s2644_s2, %s1958_s9  ;;  %p1965_p3 = scmp.lt.u32.totalorder %s1958_s9, %s2644_s2 }
  0x20   : > { %p1961_p13 = pnand %p1960_p12, %p1959_p11 }
  0x22   : > { %p1962_p0 = pneg %p1961_p13 }
  0x24   : > { %p1967_p5 = pnand %p1965_p3, %p1962_p0 }
  0x26   : > { %1970 = shalt.err (!%p1967_p5)
}
  0x27   : > { %s1971_s14 = scalar_lea.vmem %s181_s5, 3072  ;;  %p1979_p1 = scmp.lt.s32.totalorder %s181_s5, %s181_s5 }
  0x28   : > { %p1972_p7 = scmp.ne.s32.totalorder %s181_s5, %s1971_s14  ;;  %p1980_p4 = scmp.lt.s32.totalorder %s1971_s14, %s1971_s14 }
  0x2a   : > { %p1974_p9 = pnand %p1972_p7, %p1960_p12  ;;  %p1981_p8 = por %p1980_p4, %p1979_p1 }
  0x2c   : > { %p1975_p6 = pneg %p1974_p9 }
  0x2e   : > { %p1982_p2 = pnand %p1981_p8, %p1975_p6 }
  0x30   : > { %1985 = shalt.err (!%p1982_p2)
}
  0x31   : > { %s2093_s23 = smov 192   ;;  %s2094_s24 = smov 12  }
  0x32   : > { %1803 = dma.hbm_to_vmem [thread:$0]  (!%p2204_p10), %s2644_s2, 3072, %s181_s5, [#allocation6], %s2093_s23, %s2093_s23, %s2094_s24  }
  0x33   : > { %s31_s8 = sadd.s32 1, %s2082_s20  ;;  %s34_s9 = sadd.s32 1, %s2086_s21 }
  0x34   : > { %p32_p1 = scmp.ge.s32.totalorder %s31_s8, 2  ;;  %s43_s10 = sadd.s32 1, %s2070_s17 }
  0x35   : > { %p50_p2 = scmp.ne.s32.totalorder %s2070_s17, %s2066_s16  ;;  %p51_p4 = scmp.eq.s32.totalorder %s2090_s22, 0 }
  0x36   : > { %s2666_s8 = smov (%p32_p1, %s31_s8), 0  ;;  %s2668_s9 = smov (!%p32_p1, %s34_s9), %s2086_s21 }
  0x37   : > { %2645 = sst [smem:[#allocation17_spill]] %s2666_s8  ;;  %s39_s11 = ssub.s32 %s2082_s20, %s2666_s8 }
  0x38   : > { %p36_p6 = scmp.ge.s32.totalorder %s2668_s9, 2  ;;  %p2646_p8 = scmp.ne.s32.totalorder %s2638_s26, 0 }
  0x39   : > { %p2241_p10 = por %p51_p4, %p50_p2  ;;  %p1813_p12 = scmp.lt.s32.totalorder %s2090_s22, 4 }
  0x3a   : > { %p2237_p11 = por %p2646_p8, %p50_p2  ;;  %s2670_s9 = smov (%p36_p6, %s2668_s9), 0 }
  0x3b   : > { %2649 = sst [smem:[#allocation18_spill]] %s2670_s9  ;;  %s194_s12 = sand.u32 1, %s2070_s17  }
  0x3c   : > { %s1472_s13 = sshll.u32 %s2082_s20, 4  ;;  %s38_s14 = ssub.s32 %s2086_s21, %s2670_s9 }
  0x3d   : > { %s40_s23 = sor.u32 %s39_s11, %s38_s14  ;;  %s1471_s24 = sshll.u32 %s194_s12, 7 }
  0x3e   : > { %p41_p13 = scmp.eq.s32.totalorder %s40_s23, 0  ;;  %s1473_s26 = sshll.u32 %s2086_s21, 5 }
  0x3f   : > { %s198_s30 = scalar_lea.vmem [#allocation2], %s1471_s24  ;;  %s204_s8 = sadd.s32 %s1473_s26, %s1472_s13 }
  0x40   : > { %s207_s7 = sshll.u32 %s198_s30, 4  ;;  %s1474_s28 = sshll.u32 %s204_s8, 7  ;;  %s2256_s7 = int_to_ptr.vmem [resolvable:$true] %s207_s7 }
  0x41   : > { %s2254_s2 = scalar_select %p41_p13, %s2070_s17, %s43_s10  }
  0x42   : > { %p2262_p0 = pnand %p1813_p12, %p2241_p10  ;;  %s2269_s11 = scalar_lea.hbm %s2620_s0, %s1474_s28 }
  0x43   : > { %s2271_s10 = scalar_lea.sflag [#allocation3], %s194_s12  ;;  %s1986_s8 = scalar_lea.hbm %s2269_s11, 2048 }
  0x44   : > { %p1987_p3 = scmp.ne.s32.totalorder %s2269_s11, %s1986_s8  ;;  %p1988_p5 = pneg %p2262_p0 }
  0x45   : > { %s1991_s9 = scalar_lea.hbm %s2620_s0, 8192  ;;  %p1992_p1 = scmp.lt.u32.totalorder %s2269_s11, %s2620_s0 }
  0x46   : > { %p1989_p7 = pnand %p1988_p5, %p1987_p3  ;;  %p1993_p2 = scmp.lt.u32.totalorder %s1991_s9, %s1986_s8 }
  0x47   : > { %p1995_p6 = scmp.lt.u32.totalorder %s1986_s8, %s2269_s11 }
  0x48   : > { %p1990_p9 = pneg %p1989_p7  ;;  %p1994_p4 = por %p1993_p2, %p1992_p1 }
  0x4a   : > { %p1996_p8 = por %p1995_p6, %p1994_p4 }
  0x4c   : > { %p1997_p10 = pnand %p1996_p8, %p1990_p9 }
  0x4e   : > { %2000 = shalt.err (!%p1997_p10)
}
  0x4f   : > { %s2001_s12 = scalar_lea.vmem %s2256_s7, 2048  ;;  %s2095_s14 = smov [#allocation2]  }
  0x50   : > { %p2002_p12 = scmp.ne.s32.totalorder %s2256_s7, %s2001_s12  ;;  %s2006_s23 = sshll.u32 %s2095_s14, 4  ;;  %s2007_s23 = int_to_ptr.vmem [resolvable:$false] %s2006_s23 }
  0x51   : > { %s2008_s24 = scalar_lea.vmem %s2007_s23, 4096  ;;  %p2009_p7 = scmp.lt.s32.totalorder %s2256_s7, %s2007_s23 }
  0x52   : > { %p2004_p13 = pnand %p2002_p12, %p1988_p5  ;;  %p2010_p1 = scmp.lt.s32.totalorder %s2008_s24, %s2001_s12 }
  0x54   : > { %p2005_p3 = pneg %p2004_p13  ;;  %p2011_p2 = por %p2010_p1, %p2009_p7 }
  0x56   : > { %p2012_p4 = pnand %p2011_p2, %p2005_p3 }
  0x58   : > { %2015 = shalt.err (!%p2012_p4)
}
  0x59   : > { %s2096_s26 = smov 128   ;;  %s2097_s30 = smov 8  }
  0x5a   : > { %1807 = dma.hbm_to_vmem [thread:$0]  (!%p2262_p0), %s2269_s11, 2048, %s2256_s7, %s2271_s10, %s2096_s26, %s2096_s26, %s2097_s30  }
  0x5b   : > { %p2651_p5 = scmp.ne.s32.totalorder %s2642_s29, 0 }
  0x5c   : > { %s2302_s8 = sand.u32 (!%p2651_p5), 1, %s2066_s16   ;;  %p2652_p9 = scmp.ne.s32.totalorder (!%p2651_p5), %s2639_s27, 0 }
  0x5d   : > { %219 = sbr.rel (%p2651_p5) target bundleno = 683 (0x2ab), region = 32  ;;  %s2305_s5 = sshll.u32 (!%p2651_p5), %s2302_s8, 7 }
  0x5e   : > { %s222_s20 = scalar_lea.sflag (!%p2651_p5), [#allocation3], %s2302_s8  ;;  %s2309_s9 = scalar_lea.vmem (!%p2651_p5), [#allocation2], %s2305_s5 }
  0x64   : > { %2049 = dma.done.wait (%p2652_p9), %s222_s20, 2048  }
  0x65   : > { %2051 = vsyncadd (%p2652_p9), %s222_s20, 4294965248  ;;  %p2653_p0 = scmp.ne.s32.totalorder %s2637_s25, 0 }
  0x67   : > { %2053 = dma.done.wait (%p2653_p0), [#allocation6], 3072  }
  0x68   : > { %2055 = vsyncadd (%p2653_p0), [#allocation6], 4294964224  ;;  %v2320_v0 = vld [vmem:[%s2309_s9] sm:$0xff]  ;;  %v2323_v1 = vld [vmem:[%s2309_s9 + $0x10] sm:$0xff]  ;;  %v2098_v53 = vmov 0   ;;  %vm888_vm0 = vcmask 519168  }
  0x69   : > { %v2326_v2 = vld [vmem:[%s2309_s9 + $0x8] sm:$0xff]  ;;  %v278_v3 = vmul.f32 %v2320_v0, %v2320_v0  ;;  %v280_v4 = vmul.f32 %v2323_v1, %v2323_v1  ;;  %v2333_v5 = vld [vmem:[%s2309_s9 + $0x18] sm:$0xff]  ;;  %v2343_v9 = vld [vmem:[%s2309_s9 + $0x20] sm:$0xff]  ;;  %614 = vmatprep.mubr.bf16.mxu0 %v2098_v53  ;;  %s2445_s27 = scalar_lea.vmem [#allocation7], %s2305_s5  ;;  %s2099_s29 = smov 64  }
  0x6a   : > { %v279_v6 = vmul.f32 %v2326_v2, %v2326_v2  ;;  %v281_v7 = vmul.f32 %v2333_v5, %v2333_v5  ;;  %v2340_v8 = vld [vmem:[%s2309_s9 + $0x28] sm:$0xff]  ;;  %v2346_v10 = vld [vmem:[%s2309_s9 + $0x38] sm:$0xff]  ;;  %v2349_v11 = vld [vmem:[%s2309_s9 + $0x30] sm:$0xff]  ;;  %v282_v15 = vmul.f32 %v2343_v9, %v2343_v9  ;;  %s2451_s7 = scalar_lea.vmem [#allocation8], %s2305_s5  ;;  %s1120_s11 = scalar_lea.sflag [#allocation4], %s2302_s8 }
  0x6b   : > { %294 = vadd.xlane.f32.xlu0 %v278_v3  ;;  %298 = vadd.xlane.f32.xlu1 %v280_v4  ;;  %v1894_v12 = vld [vmem:[#allocation5 + $0x4] ss:$12 sps:$4 sm:$0xff]   ;;  %v1896_v13 = vld [vmem:[#allocation5] ss:$12 sps:$4 sm:$0xff]   ;;  %v283_v14 = vmul.f32 %v2340_v8, %v2340_v8  ;;  %v1897_v16 = vld [vmem:[#allocation5 + $0x8] ss:$12 sps:$4 sm:$0xff]   ;;  %v285_v22 = vmul.f32 %v2346_v10, %v2346_v10  ;;  %v284_v23 = vmul.f32 %v2349_v11, %v2349_v11 }
  0x6c   : > { %582 = vmatprep.subr.bf16.mxu0 %v1894_v12  ;;  %v1898_v17 = vld [vmem:[#allocation5 + $0x1c] ss:$12 sps:$4 sm:$0xff]   ;;  %v1900_v18 = vld [vmem:[#allocation5 + $0x18] ss:$12 sps:$4 sm:$0xff]   ;;  %1754 = vmatprep.subr.bf16.mxu1 %v1897_v16  ;;  %v1901_v19 = vld [vmem:[#allocation5 + $0x20] ss:$12 sps:$4 sm:$0xff]  }
  0x6d   : > { %583 = vmatpush1.bf16.msra.mxu0 %v1896_v13  ;;  %v2356_v20 = vld [vmem:[%s2309_s9 + $0x48] sm:$0xff]  ;;  %v2359_v21 = vld [vmem:[%s2309_s9 + $0x40] sm:$0xff]  ;;  %1755 = vmatpush3.bf16.msra.mxu1 %v1897_v16  ;;  %v2366_v24 = vld [vmem:[%s2309_s9 + $0x58] sm:$0xff]  ;;  %s1587_s10 = sshll.u32 (%p2237_p11), %s2074_s18, 4  ;;  %s1588_s28 = sshll.u32 (%p2237_p11), %s2078_s19, 6 }
  0x6e   : > { %584 = vmatprep.subr.bf16.mxu0 %v1898_v17  ;;  %1756 = vmatprep.subr.bf16.mxu1 %v1901_v19  ;;  %v2369_v25 = vld [vmem:[%s2309_s9 + $0x50] sm:$0xff]  ;;  %v287_v26 = vmul.f32 %v2356_v20, %v2356_v20  ;;  %v286_v27 = vmul.f32 %v2359_v21, %v2359_v21  ;;  %v1905_v30 = vld [vmem:[#allocation5 + $0x38] ss:$12 sps:$4 sm:$0xff]   ;;  %v289_v31 = vmul.f32 %v2366_v24, %v2366_v24  ;;  %v2380_v33 = vld [vmem:[%s2309_s9 + $0x68] sm:$0xff]  ;;  %s1129_s13 = sadd.s32 (%p2237_p11), %s1588_s28, %s1587_s10 }
  0x6f   : > { %296 = vadd.xlane.f32.xlu0 %v279_v6  ;;  %300 = vadd.xlane.f32.xlu1 %v281_v7  ;;  %v1902_v28 = vld [vmem:[#allocation5 + $0x34] ss:$12 sps:$4 sm:$0xff]   ;;  %v1904_v29 = vld [vmem:[#allocation5 + $0x30] ss:$12 sps:$4 sm:$0xff]   ;;  %v288_v32 = vmul.f32 %v2369_v25, %v2369_v25  ;;  %v1906_v35 = vld [vmem:[#allocation5 + $0x4c] ss:$12 sps:$4 sm:$0xff]   ;;  %v291_v38 = vmul.f32 %v2380_v33, %v2380_v33 }
  0x70   : > { %v2383_v34 = vld [vmem:[%s2309_s9 + $0x60] sm:$0xff]  ;;  %v1908_v36 = vld [vmem:[#allocation5 + $0x48] ss:$12 sps:$4 sm:$0xff]   ;;  %v1909_v37 = vld [vmem:[#allocation5 + $0x50] ss:$12 sps:$4 sm:$0xff]   ;;  %s1589_s12 = sshll.u32 (%p2237_p11), %s1129_s13, 2 }
  0x71   : > { %585 = vmatpush1.bf16.msra.mxu0 %v1900_v18  ;;  %1757 = vmatpush3.bf16.msra.mxu1 %v1901_v19  ;;  %v290_v39 = vmul.f32 %v2383_v34, %v2383_v34  ;;  %v2390_v40 = vld [vmem:[%s2309_s9 + $0x78] sm:$0xff]  ;;  %v2393_v41 = vld [vmem:[%s2309_s9 + $0x70] sm:$0xff]  ;;  %v1912_v43 = vld [vmem:[#allocation5 + $0x60] ss:$12 sps:$4 sm:$0xff]   ;;  %s1131_s24 = scalar_lea.vmem (%p2237_p11), %s2623_s3, %s1589_s12 }
  0x72   : > { %586 = vmatprep.subr.bf16.mxu0 %v1902_v28  ;;  %1758 = vmatprep.subr.bf16.mxu1 %v1905_v30  ;;  %v1910_v42 = vld [vmem:[#allocation5 + $0x64] ss:$12 sps:$4 sm:$0xff]   ;;  %v1913_v44 = vld [vmem:[#allocation5 + $0x68] ss:$12 sps:$4 sm:$0xff]   ;;  %v1917_v46 = vld [vmem:[#allocation5 + $0x80] ss:$12 sps:$4 sm:$0xff]   ;;  %v293_v47 = vmul.f32 %v2390_v40, %v2390_v40  ;;  %v292_v48 = vmul.f32 %v2393_v41, %v2393_v41 }
  0x73   : > { %304 = vadd.xlane.f32.xlu1 %v283_v14  ;;  %302 = vadd.xlane.f32.xlu0 %v282_v15  ;;  %v1914_v45 = vld [vmem:[#allocation5 + $0x7c] ss:$12 sps:$4 sm:$0xff]   ;;  %v1916_v49 = vld [vmem:[#allocation5 + $0x78] ss:$12 sps:$4 sm:$0xff]   ;;  %v1918_v50 = vld [vmem:[#allocation5 + $0x94] ss:$12 sps:$4 sm:$0xff]  }
  0x74   : > { %v1921_v51 = vld [vmem:[#allocation5 + $0x98] ss:$12 sps:$4 sm:$0xff]   ;;  %v1920_v52 = vld [vmem:[#allocation5 + $0x90] ss:$12 sps:$4 sm:$0xff]   ;;  %v1924_v56 = vld [vmem:[#allocation5 + $0xa8] ss:$12 sps:$4 sm:$0xff]  }
  0x75   : > { %587 = vmatpush1.bf16.msra.mxu0 %v1904_v29  ;;  %1759 = vmatpush3.bf16.msra.mxu1 %v1905_v30  ;;  %v1922_v54 = vld [vmem:[#allocation5 + $0xac] ss:$12 sps:$4 sm:$0xff]   ;;  %v1925_v55 = vld [vmem:[#allocation5 + $0xb0] ss:$12 sps:$4 sm:$0xff]  }
  0x76   : > { %588 = vmatprep.subr.bf16.mxu0 %v1906_v35  ;;  %1760 = vmatprep.subr.bf16.mxu1 %v1909_v37 }
  0x77   : > { %308 = vadd.xlane.f32.xlu1 %v285_v22  ;;  %306 = vadd.xlane.f32.xlu0 %v284_v23 }
  0x79   : > { %589 = vmatpush1.bf16.msra.mxu0 %v1908_v36  ;;  %1761 = vmatpush3.bf16.msra.mxu1 %v1909_v37 }
  0x7a   : > { %590 = vmatprep.subr.bf16.mxu0 %v1910_v42  ;;  %1762 = vmatprep.subr.bf16.mxu1 %v1913_v44  ;;  %v2405_v42 = vld [vmem:[%s2621_s1] ss:$0 sm:$0xff] }
  0x7b   : > { %312 = vadd.xlane.f32.xlu1 %v287_v26  ;;  %310 = vadd.xlane.f32.xlu0 %v286_v27 }
  0x7d   : > { %591 = vmatpush1.bf16.msra.mxu0 %v1912_v43  ;;  %1763 = vmatpush3.bf16.msra.mxu1 %v1913_v44 }
  0x7e   : > { %592 = vmatprep.subr.bf16.mxu0 %v1914_v45  ;;  %1764 = vmatprep.subr.bf16.mxu1 %v1917_v46 }
  0x7f   : > { %316 = vadd.xlane.f32.xlu1 %v289_v31  ;;  %314 = vadd.xlane.f32.xlu0 %v288_v32 }
  0x81   : > { %593 = vmatpush1.bf16.msra.mxu0 %v1916_v49  ;;  %1765 = vmatpush3.bf16.msra.mxu1 %v1917_v46 }
  0x82   : > { %594 = vmatprep.subr.bf16.mxu0 %v1918_v50  ;;  %1766 = vmatprep.subr.bf16.mxu1 %v1921_v51 }
  0x83   : > { %320 = vadd.xlane.f32.xlu1 %v291_v38  ;;  %318 = vadd.xlane.f32.xlu0 %v290_v39 }
  0x85   : > { %595 = vmatpush1.bf16.msra.mxu0 %v1920_v52  ;;  %1767 = vmatpush3.bf16.msra.mxu1 %v1921_v51 }
  0x86   : > { %596 = vmatprep.subr.bf16.mxu0 %v1922_v54  ;;  %1768 = vmatprep.subr.bf16.mxu1 %v1925_v55 }
  0x87   : > { %324 = vadd.xlane.f32.xlu1 %v293_v47  ;;  %322 = vadd.xlane.f32.xlu0 %v292_v48 }
  0x89   : > { %597 = vmatpush1.bf16.msra.mxu0 %v1924_v56  ;;  %1769 = vmatpush3.bf16.msra.mxu1 %v1925_v55 }
  0xf8   : > { %v295_v57 = vpop.xlane.xlu0 %294  ;;  %v299_v58 = vpop.xlane.xlu1 %298 }
  0xf9   : > { %v327_v59 = vmul.f32 0.0078125, %v295_v57  ;;  %v329_v60 = vmul.f32 0.0078125, %v299_v58 }
  0xfb   : > { %v344_v61 = vadd.f32 1e-06, %v327_v59  ;;  %v346_v62 = vadd.f32 1e-06, %v329_v60 }
  0xfc   : > { %v297_v63 = vpop.xlane.xlu0 %296  ;;  %v301_v3 = vpop.xlane.xlu1 %300 }
  0xfd   : > { %1926 = vrsqrt.f32 %v344_v61  ;;  %v328_v4 = vmul.f32 0.0078125, %v297_v63  ;;  %v330_v6 = vmul.f32 0.0078125, %v301_v3 }
  0xfe   : > { %1928 = vrsqrt.f32 %v346_v62 }
  0xff   : > { %v345_v7 = vadd.f32 1e-06, %v328_v4  ;;  %v347_v12 = vadd.f32 1e-06, %v330_v6 }
 0x100   : > { %v305_v13 = vpop.xlane.xlu1 %304  ;;  %v303_v14 = vpop.xlane.xlu0 %302 }
 0x101   : > { %1930 = vrsqrt.f32 %v345_v7  ;;  %v332_v15 = vmul.f32 0.0078125, %v305_v13  ;;  %v331_v16 = vmul.f32 0.0078125, %v303_v14 }
 0x102   : > { %1932 = vrsqrt.f32 %v347_v12 }
 0x103   : > { %v349_v17 = vadd.f32 1e-06, %v332_v15  ;;  %v348_v18 = vadd.f32 1e-06, %v331_v16 }
 0x104   : > { %v309_v19 = vpop.xlane.xlu1 %308  ;;  %v307_v22 = vpop.xlane.xlu0 %306 }
 0x105   : > { %1934 = vrsqrt.f32 %v349_v17  ;;  %v334_v23 = vmul.f32 0.0078125, %v309_v19  ;;  %v333_v26 = vmul.f32 0.0078125, %v307_v22 }
 0x106   : > { %1936 = vrsqrt.f32 %v348_v18 }
 0x107   : > { %v1927_v27 = vpop.eup %1926  ;;  %v351_v28 = vadd.f32 1e-06, %v334_v23  ;;  %v350_v29 = vadd.f32 1e-06, %v333_v26 }
 0x108   : > { %v1929_v30 = vpop.eup %1928  ;;  %v313_v31 = vpop.xlane.xlu1 %312  ;;  %v376_v38 = vmul.f32 %v1927_v27, %v2320_v0 }
 0x109   : > { %v311_v32 = vpop.xlane.xlu0 %310  ;;  %1938 = vrsqrt.f32 %v351_v28  ;;  %v378_v35 = vmul.f32 %v1929_v30, %v2323_v1  ;;  %v336_v36 = vmul.f32 0.0078125, %v313_v31 }
 0x10a   : > { %v335_v37 = vmul.f32 0.0078125, %v311_v32  ;;  %1940 = vrsqrt.f32 %v350_v29  ;;  %v398_v51 = vmul.f32 %v2405_v42, %v376_v38 }
 0x10b   : > { %v1931_v39 = vpop.eup %1930  ;;  %v353_v43 = vadd.f32 1e-06, %v336_v36  ;;  %v400_v47 = vmul.f32 %v2405_v42, %v378_v35 }
 0x10c   : > { %v352_v44 = vadd.f32 1e-06, %v335_v37  ;;  %v1933_v45 = vpop.eup %1932  ;;  %v377_v46 = vmul.f32 %v1931_v39, %v2326_v2  ;;  %v317_v48 = vpop.xlane.xlu1 %316 }
 0x10d   : > { %v315_v1 = vpop.xlane.xlu0 %314  ;;  %v379_v49 = vmul.f32 %v1933_v45, %v2333_v5  ;;  %1942 = vrsqrt.f32 %v353_v43  ;;  %v338_v50 = vmul.f32 0.0078125, %v317_v48 }
 0x10e   : > { %v337_v0 = vmul.f32 0.0078125, %v315_v1  ;;  %v399_v52 = vmul.f32 %v2405_v42, %v377_v46  ;;  %1944 = vrsqrt.f32 %v352_v44 }
 0x10f   : > { %v1935_v54 = vpop.eup %1934  ;;  %v401_v55 = vmul.f32 %v2405_v42, %v379_v49  ;;  %v355_v56 = vadd.f32 1e-06, %v338_v50 }
 0x110   : > { %v354_v57 = vadd.f32 1e-06, %v337_v0  ;;  %v1937_v2 = vpop.eup %1936  ;;  %v414_v58 = vpack.c.bf16 %v399_v52, %v398_v51  ;;  %v381_v59 = vmul.f32 %v1935_v54, %v2340_v8  ;;  %v321_v60 = vpop.xlane.xlu1 %320 }
 0x111   : > { %v319_v61 = vpop.xlane.xlu0 %318  ;;  %v415_v5 = vpack.c.bf16 %v401_v55, %v400_v47  ;;  %1946 = vrsqrt.f32 %v355_v56  ;;  %v380_v62 = vmul.f32 %v1937_v2, %v2343_v9  ;;  %v340_v63 = vmul.f32 0.0078125, %v321_v60 }
 0x112   : > { %615 = vmatmul.mubr.bf16.vlgmr.msra.gmra.mrb[0].mxu0 %v414_v58  ;;  %1770 = vmatprep.mubr.bf16.mxu1 %v414_v58  ;;  %1948 = vrsqrt.f32 %v354_v57  ;;  %v403_v3 = vmul.f32 %v2405_v42, %v381_v59  ;;  %v339_v4 = vmul.f32 0.0078125, %v319_v61 }
 0x113   : > { %v1939_v6 = vpop.eup %1938  ;;  %1771 = vmatmul.mubr.bf16.vlgmr.msra.gmra.mrb[0].mxu1 %v415_v5  ;;  %624 = vmatprep.mubr.bf16.mxu0 %v2098_v53  ;;  %v402_v7 = vmul.f32 %v2405_v42, %v380_v62  ;;  %v357_v8 = vadd.f32 1e-06, %v340_v63 }
 0x114   : > { %v1941_v12 = vpop.eup %1940  ;;  %v383_v13 = vmul.f32 %v1939_v6, %v2346_v10  ;;  %v356_v14 = vadd.f32 1e-06, %v339_v4  ;;  %v325_v15 = vpop.xlane.xlu1 %324 }
 0x115   : > { %v323_v9 = vpop.xlane.xlu0 %322  ;;  %v416_v16 = vpack.c.bf16 %v403_v3, %v402_v7  ;;  %v382_v17 = vmul.f32 %v1941_v12, %v2349_v11  ;;  %1950 = vrsqrt.f32 %v357_v8  ;;  %v342_v18 = vmul.f32 0.0078125, %v325_v15 }
 0x116   : > { %v405_v19 = vmul.f32 %v2405_v42, %v383_v13  ;;  %1952 = vrsqrt.f32 %v356_v14  ;;  %v341_v22 = vmul.f32 0.0078125, %v323_v9 }
 0x117   : > { %v1943_v23 = vpop.eup %1942  ;;  %1774 = vmatprep.mubr.bf16.mxu1 %v416_v16  ;;  %v404_v26 = vmul.f32 %v2405_v42, %v382_v17  ;;  %v359_v27 = vadd.f32 1e-06, %v342_v18 }
 0x118   : > { %v1945_v28 = vpop.eup %1944  ;;  %v358_v29 = vadd.f32 1e-06, %v341_v22  ;;  %v385_v10 = vmul.f32 %v1943_v23, %v2356_v20 }
 0x119   : > { %v417_v30 = vpack.c.bf16 %v405_v19, %v404_v26  ;;  %1954 = vrsqrt.f32 %v359_v27  ;;  %v384_v31 = vmul.f32 %v1945_v28, %v2359_v21 }
 0x11a   : > { %625 = vmatmul.mubr.bf16.gmra.mrb[4].mxu0 %v415_v5  ;;  %1956 = vrsqrt.f32 %v358_v29  ;;  %v407_v11 = vmul.f32 %v2405_v42, %v385_v10 }
 0x11b   : > { %v1947_v32 = vpop.eup %1946  ;;  %634 = vmatprep.mubr.bf16.mxu0 %v2098_v53  ;;  %1775 = vmatmul.mubr.bf16.gmra.mrb[4].mxu1 %v417_v30  ;;  %v406_v35 = vmul.f32 %v2405_v42, %v384_v31 }
 0x11c   : > { %v1949_v36 = vpop.eup %1948  ;;  %v387_v37 = vmul.f32 %v1947_v32, %v2366_v24 }
 0x11d   : > { %v418_v38 = vpack.c.bf16 %v407_v11, %v406_v35  ;;  %v386_v20 = vmul.f32 %v1949_v36, %v2369_v25 }
 0x11e   : > { %v409_v39 = vmul.f32 %v2405_v42, %v387_v37 }
 0x11f   : > { %v1951_v43 = vpop.eup %1950  ;;  %1778 = vmatprep.mubr.bf16.mxu1 %v418_v38  ;;  %v408_v21 = vmul.f32 %v2405_v42, %v386_v20 }
 0x120   : > { %v1953_v44 = vpop.eup %1952  ;;  %v389_v45 = vmul.f32 %v1951_v43, %v2380_v33 }
 0x121   : > { %v419_v46 = vpack.c.bf16 %v409_v39, %v408_v21  ;;  %v388_v47 = vmul.f32 %v1953_v44, %v2383_v34 }
 0x122   : > { %635 = vmatmul.mubr.bf16.gmra.mrb[8].mxu0 %v416_v16  ;;  %v411_v48 = vmul.f32 %v2405_v42, %v389_v45 }
 0x123   : > { %v1955_v1 = vpop.eup %1954  ;;  %644 = vmatprep.mubr.bf16.mxu0 %v2098_v53  ;;  %1779 = vmatmul.mubr.bf16.gmra.mrb[8].mxu1 %v419_v46  ;;  %v410_v24 = vmul.f32 %v2405_v42, %v388_v47 }
 0x124   : > { %v1957_v25 = vpop.eup %1956  ;;  %v391_v49 = vmul.f32 %v1955_v1, %v2390_v40 }
 0x125   : > { %v420_v50 = vpack.c.bf16 %v411_v48, %v410_v24  ;;  %v390_v0 = vmul.f32 %v1957_v25, %v2393_v41 }
 0x126   : > { %v413_v33 = vmul.f32 %v2405_v42, %v391_v49 }
 0x127   : > { %1782 = vmatprep.mubr.bf16.mxu1 %v420_v50  ;;  %v412_v34 = vmul.f32 %v2405_v42, %v390_v0 }
 0x129   : > { %v421_v51 = vpack.c.bf16 %v413_v33, %v412_v34 }
 0x12a   : > { %645 = vmatmul.mubr.bf16.gmra.mrb[12].mxu0 %v417_v30 }
 0x12b   : > { %654 = vmatprep.mubr.bf16.mxu0 %v2098_v53  ;;  %1783 = vmatmul.mubr.bf16.gmra.mrb[12].mxu1 %v421_v51 }
 0x132   : > { %655 = vmatmul.mubr.bf16.gmra.mrb[16].mxu0 %v418_v38 }
 0x133   : > { %664 = vmatprep.mubr.bf16.mxu0 %v2098_v53 }
 0x13a   : > { %665 = vmatmul.mubr.bf16.gmra.mrb[20].mxu0 %v419_v46 }
 0x13b   : > { %674 = vmatprep.mubr.bf16.mxu0 %v2098_v53 }
 0x142   : > { %675 = vmatmul.mubr.bf16.gmra.mrb[24].mxu0 %v420_v50 }
 0x143   : > { %684 = vmatprep.mubr.bf16.mxu0 %v2098_v53 }
 0x14a   : > { %685 = vmatmul.mubr.bf16.gmra.mrb[28].mxu0 %v421_v51 }
 0x1e5   : > { %v616_v40 = vpop.f32.mrb[0].mxu0 }
 0x1e6   : > { %v792_v41 = vmul.f32 0.70710677, %v616_v40  ;;  %v618_v52 = vpop.f32.mrb[1].mxu0  ;;  %v1772_v42 = vpop.f32.mrb[0].mxu1 }
 0x1e7   : > { %v620_v54 = vpop.f32.mrb[2].mxu0  ;;  %v729_v55 = vpop.f32.mrb[1].mxu1 }
 0x1e8   : > { %v1595_v56 = vpack.c.bf16 %v792_v41, %v792_v41  ;;  %v793_v57 = vmul.f32 0.70710677, %v620_v54  ;;  %v622_v2 = vpop.f32.mrb[3].mxu0  ;;  %v1773_v58 = vpop.f32.mrb[2].mxu1 }
 0x1e9   : > { %v1646_v59 = vpack.c.bf16 %v622_v2, %v618_v52  ;;  %v1691_v60 = vpack.c.bf16 %v1773_v58, %v1772_v42  ;;  %v732_v61 = vpop.f32.mrb[3].mxu1 }
 0x1ea   : > { %889 = vst.msk [vmem:[%s2445_s27] sm:$0xf] %vm888_vm0, %v1595_v56  ;;  %v1596_v53 = vpack.c.bf16 %v793_v57, %v793_v57  ;;  %v1686_v5 = vpack.c.bf16 %v732_v61, %v729_v55  ;;  %977 = vrot.lane.b32.xlu0 %v1595_v56, %s2099_s29 }
 0x1eb   : > { %1647 = vst [vmem:[%s2451_s7] sm:$0xff] %v1646_v59   ;;  %1731 = vst [vmem:[%s2451_s7 + $0x48] sm:$0xff] %v1691_v60  }
 0x1ec   : > { %890 = vst.msk [vmem:[%s2445_s27 + $0x4] sm:$0xf] %vm888_vm0, %v1596_v53  ;;  %1730 = vst [vmem:[%s2451_s7 + $0x40] sm:$0xff] %v1686_v5   ;;  %979 = vrot.lane.b32.xlu1 %v1596_v53, %s2099_s29 }
 0x1ed   : > { %v626_v62 = vpop.f32.mrb[4].mxu0 }
 0x1ee   : > { %v794_v63 = vmul.f32 0.70710677, %v626_v62  ;;  %v628_v3 = vpop.f32.mrb[5].mxu0  ;;  %v1776_v4 = vpop.f32.mrb[4].mxu1 }
 0x1ef   : > { %v630_v6 = vpop.f32.mrb[6].mxu0  ;;  %v745_v7 = vpop.f32.mrb[5].mxu1 }
 0x1f0   : > { %v1597_v8 = vpack.c.bf16 %v794_v63, %v794_v63  ;;  %v795_v12 = vmul.f32 0.70710677, %v630_v6  ;;  %v632_v13 = vpop.f32.mrb[7].mxu0  ;;  %v1777_v14 = vpop.f32.mrb[6].mxu1 }
 0x1f1   : > { %v1651_v15 = vpack.c.bf16 %v632_v13, %v628_v3  ;;  %v1701_v9 = vpack.c.bf16 %v1777_v14, %v1776_v4  ;;  %v748_v16 = vpop.f32.mrb[7].mxu1 }
 0x1f2   : > { %891 = vst.msk [vmem:[%s2445_s27 + $0x8] sm:$0xf] %vm888_vm0, %v1597_v8  ;;  %v1598_v17 = vpack.c.bf16 %v795_v12, %v795_v12  ;;  %981 = vrot.lane.b32.xlu1 %v1597_v8, %s2099_s29  ;;  %v1696_v18 = vpack.c.bf16 %v748_v16, %v745_v7 }
 0x1f3   : > { %1723 = vst [vmem:[%s2451_s7 + $0x8] sm:$0xff] %v1651_v15   ;;  %1733 = vst [vmem:[%s2451_s7 + $0x58] sm:$0xff] %v1701_v9  }
 0x1f4   : > { %892 = vst.msk [vmem:[%s2445_s27 + $0xc] sm:$0xf] %vm888_vm0, %v1598_v17  ;;  %1732 = vst [vmem:[%s2451_s7 + $0x50] sm:$0xff] %v1696_v18  }
 0x1f5   : > { %v636_v19 = vpop.f32.mrb[8].mxu0 }
 0x1f6   : > { %v796_v22 = vmul.f32 0.70710677, %v636_v19  ;;  %983 = vrot.lane.b32.xlu1 %v1598_v17, %s2099_s29  ;;  %v638_v23 = vpop.f32.mrb[9].mxu0  ;;  %v1780_v26 = vpop.f32.mrb[8].mxu1 }
 0x1f7   : > { %v640_v27 = vpop.f32.mrb[10].mxu0  ;;  %v761_v28 = vpop.f32.mrb[9].mxu1 }
 0x1f8   : > { %v1599_v29 = vpack.c.bf16 %v796_v22, %v796_v22  ;;  %v797_v10 = vmul.f32 0.70710677, %v640_v27  ;;  %v642_v30 = vpop.f32.mrb[11].mxu0  ;;  %v1781_v31 = vpop.f32.mrb[10].mxu1 }
 0x1f9   : > { %v1656_v11 = vpack.c.bf16 %v642_v30, %v638_v23  ;;  %v1711_v32 = vpack.c.bf16 %v1781_v31, %v1780_v26  ;;  %v764_v35 = vpop.f32.mrb[11].mxu1 }
 0x1fa   : > { %893 = vst.msk [vmem:[%s2445_s27 + $0x10] sm:$0xf] %vm888_vm0, %v1599_v29  ;;  %v1600_v36 = vpack.c.bf16 %v797_v10, %v797_v10  ;;  %985 = vrot.lane.b32.xlu0 %v1599_v29, %s2099_s29  ;;  %v1706_v37 = vpack.c.bf16 %v764_v35, %v761_v28 }
 0x1fb   : > { %1724 = vst [vmem:[%s2451_s7 + $0x10] sm:$0xff] %v1656_v11   ;;  %1735 = vst [vmem:[%s2451_s7 + $0x68] sm:$0xff] %v1711_v32  }
 0x1fc   : > { %894 = vst.msk [vmem:[%s2445_s27 + $0x14] sm:$0xf] %vm888_vm0, %v1600_v36  ;;  %987 = vrot.lane.b32.xlu1 %v1600_v36, %s2099_s29  ;;  %1734 = vst [vmem:[%s2451_s7 + $0x60] sm:$0xff] %v1706_v37  }
 0x1fd   : > { %v646_v38 = vpop.f32.mrb[12].mxu0 }
 0x1fe   : > { %v798_v20 = vmul.f32 0.70710677, %v646_v38  ;;  %v648_v39 = vpop.f32.mrb[13].mxu0  ;;  %v1784_v43 = vpop.f32.mrb[12].mxu1 }
 0x1ff   : > { %v650_v21 = vpop.f32.mrb[14].mxu0  ;;  %v777_v44 = vpop.f32.mrb[13].mxu1 }
 0x200   : > { %v1601_v45 = vpack.c.bf16 %v798_v20, %v798_v20  ;;  %v799_v46 = vmul.f32 0.70710677, %v650_v21  ;;  %v652_v47 = vpop.f32.mrb[15].mxu0  ;;  %v1785_v48 = vpop.f32.mrb[14].mxu1  ;;  %v1151_v21 = vld [vmem:[%s2445_s27 + $0x8] sm:$0xff] (%p2237_p11)  }
 0x201   : > { %v1661_v1 = vpack.c.bf16 %v652_v47, %v648_v39  ;;  %v1721_v24 = vpack.c.bf16 %v1785_v48, %v1784_v43  ;;  %v780_v25 = vpop.f32.mrb[15].mxu1  ;;  %v1147_v43 = vld [vmem:[%s2445_s27] sm:$0xff] (%p2237_p11)   ;;  %1152 = vst [vmem:[%s1131_s24 + $0x8] sm:$0xff] (%p2237_p11), %v1151_v21  }
 0x202   : > { %895 = vst.msk [vmem:[%s2445_s27 + $0x18] sm:$0xf] %vm888_vm0, %v1601_v45  ;;  %v1602_v49 = vpack.c.bf16 %v799_v46, %v799_v46  ;;  %989 = vrot.lane.b32.xlu0 %v1601_v45, %s2099_s29  ;;  %v1716_v50 = vpack.c.bf16 %v780_v25, %v777_v44  ;;  %1148 = vst [vmem:[%s1131_s24] sm:$0xff] (%p2237_p11), %v1147_v43  }
 0x203   : > { %1725 = vst [vmem:[%s2451_s7 + $0x18] sm:$0xff] %v1661_v1   ;;  %1737 = vst [vmem:[%s2451_s7 + $0x78] sm:$0xff] %v1721_v24   ;;  %v1155_v44 = vld [vmem:[%s2445_s27 + $0x10] sm:$0xff] (%p2237_p11)  }
 0x204   : > { %896 = vst.msk [vmem:[%s2445_s27 + $0x1c] sm:$0xf] %vm888_vm0, %v1602_v49  ;;  %991 = vrot.lane.b32.xlu1 %v1602_v49, %s2099_s29  ;;  %1736 = vst [vmem:[%s2451_s7 + $0x70] sm:$0xff] %v1716_v50  }
 0x205   : > { %v656_v0 = vpop.f32.mrb[16].mxu0  ;;  %1156 = vst [vmem:[%s1131_s24 + $0x10] sm:$0xff] (%p2237_p11), %v1155_v44  }
 0x206   : > { %v800_v33 = vmul.f32 0.70710677, %v656_v0  ;;  %v658_v34 = vpop.f32.mrb[17].mxu0 }
 0x207   : > { %v660_v51 = vpop.f32.mrb[18].mxu0 }
 0x208   : > { %v1603_v40 = vpack.c.bf16 %v800_v33, %v800_v33  ;;  %v801_v41 = vmul.f32 0.70710677, %v660_v51  ;;  %v662_v52 = vpop.f32.mrb[19].mxu0 }
 0x209   : > { %v1666_v42 = vpack.c.bf16 %v662_v52, %v658_v34 }
 0x20a   : > { %897 = vst.msk [vmem:[%s2445_s27 + $0x20] sm:$0xf] %vm888_vm0, %v1603_v40  ;;  %v1604_v54 = vpack.c.bf16 %v801_v41, %v801_v41  ;;  %993 = vrot.lane.b32.xlu0 %v1603_v40, %s2099_s29 }
 0x20b   : > { %1726 = vst [vmem:[%s2451_s7 + $0x20] sm:$0xff] %v1666_v42   ;;  %v1159_v45 = vld [vmem:[%s2445_s27 + $0x18] sm:$0xff] (%p2237_p11)  }
 0x20c   : > { %898 = vst.msk [vmem:[%s2445_s27 + $0x24] sm:$0xf] %vm888_vm0, %v1604_v54  ;;  %995 = vrot.lane.b32.xlu1 %v1604_v54, %s2099_s29  ;;  %1160 = vst [vmem:[%s1131_s24 + $0x18] sm:$0xff] (%p2237_p11), %v1159_v45  }
 0x20d   : > { %v666_v55 = vpop.f32.mrb[20].mxu0 }
 0x20e   : > { %v802_v56 = vmul.f32 0.70710677, %v666_v55  ;;  %v668_v57 = vpop.f32.mrb[21].mxu0 }
 0x20f   : > { %v670_v2 = vpop.f32.mrb[22].mxu0 }
 0x210   : > { %v1605_v58 = vpack.c.bf16 %v802_v56, %v802_v56  ;;  %v803_v59 = vmul.f32 0.70710677, %v670_v2  ;;  %v672_v60 = vpop.f32.mrb[23].mxu0 }
 0x211   : > { %v1671_v61 = vpack.c.bf16 %v672_v60, %v668_v57 }
 0x212   : > { %899 = vst.msk [vmem:[%s2445_s27 + $0x28] sm:$0xf] %vm888_vm0, %v1605_v58  ;;  %v1606_v53 = vpack.c.bf16 %v803_v59, %v803_v59  ;;  %997 = vrot.lane.b32.xlu0 %v1605_v58, %s2099_s29 }
 0x213   : > { %1727 = vst [vmem:[%s2451_s7 + $0x28] sm:$0xff] %v1671_v61   ;;  %v1163_v46 = vld [vmem:[%s2445_s27 + $0x20] sm:$0xff] (%p2237_p11)  }
 0x214   : > { %900 = vst.msk [vmem:[%s2445_s27 + $0x2c] sm:$0xf] %vm888_vm0, %v1606_v53  ;;  %999 = vrot.lane.b32.xlu1 %v1606_v53, %s2099_s29  ;;  %1164 = vst [vmem:[%s1131_s24 + $0x20] sm:$0xff] (%p2237_p11), %v1163_v46  }
 0x215   : > { %v676_v5 = vpop.f32.mrb[24].mxu0 }
 0x216   : > { %v804_v62 = vmul.f32 0.70710677, %v676_v5  ;;  %v678_v63 = vpop.f32.mrb[25].mxu0 }
 0x217   : > { %v680_v3 = vpop.f32.mrb[26].mxu0 }
 0x218   : > { %v1607_v4 = vpack.c.bf16 %v804_v62, %v804_v62  ;;  %v805_v6 = vmul.f32 0.70710677, %v680_v3  ;;  %v682_v7 = vpop.f32.mrb[27].mxu0 }
 0x219   : > { %v1676_v8 = vpack.c.bf16 %v682_v7, %v678_v63 }
 0x21a   : > { %901 = vst.msk [vmem:[%s2445_s27 + $0x30] sm:$0xf] %vm888_vm0, %v1607_v4  ;;  %v1608_v12 = vpack.c.bf16 %v805_v6, %v805_v6  ;;  %1001 = vrot.lane.b32.xlu0 %v1607_v4, %s2099_s29 }
 0x21b   : > { %1728 = vst [vmem:[%s2451_s7 + $0x30] sm:$0xff] %v1676_v8   ;;  %v1167_v47 = vld [vmem:[%s2445_s27 + $0x28] sm:$0xff] (%p2237_p11)  }
 0x21c   : > { %902 = vst.msk [vmem:[%s2445_s27 + $0x34] sm:$0xf] %vm888_vm0, %v1608_v12  ;;  %1003 = vrot.lane.b32.xlu1 %v1608_v12, %s2099_s29  ;;  %1168 = vst [vmem:[%s1131_s24 + $0x28] sm:$0xff] (%p2237_p11), %v1167_v47  }
 0x21d   : > { %v686_v13 = vpop.f32.mrb[28].mxu0 }
 0x21e   : > { %v806_v14 = vmul.f32 0.70710677, %v686_v13  ;;  %v688_v15 = vpop.f32.mrb[29].mxu0 }
 0x21f   : > { %v690_v9 = vpop.f32.mrb[30].mxu0 }
 0x220   : > { %v1609_v16 = vpack.c.bf16 %v806_v14, %v806_v14  ;;  %v807_v17 = vmul.f32 0.70710677, %v690_v9  ;;  %v692_v18 = vpop.f32.mrb[31].mxu0 }
 0x221   : > { %v1681_v19 = vpack.c.bf16 %v692_v18, %v688_v15 }
 0x222   : > { %903 = vst.msk [vmem:[%s2445_s27 + $0x38] sm:$0xf] %vm888_vm0, %v1609_v16  ;;  %v1610_v22 = vpack.c.bf16 %v807_v17, %v807_v17  ;;  %1005 = vrot.lane.b32.xlu0 %v1609_v16, %s2099_s29 }
 0x223   : > { %1729 = vst [vmem:[%s2451_s7 + $0x38] sm:$0xff] %v1681_v19   ;;  %v1171_v48 = vld [vmem:[%s2445_s27 + $0x30] sm:$0xff] (%p2237_p11)  }
 0x224   : > { %904 = vst.msk [vmem:[%s2445_s27 + $0x3c] sm:$0xf] %vm888_vm0, %v1610_v22  ;;  %1007 = vrot.lane.b32.xlu1 %v1610_v22, %s2099_s29  ;;  %1172 = vst [vmem:[%s1131_s24 + $0x30] sm:$0xff] (%p2237_p11), %v1171_v48  }
 0x22b   : > { %v1175_v1 = vld [vmem:[%s2445_s27 + $0x38] sm:$0xff] (%p2237_p11)  }
 0x22c   : > { %1176 = vst [vmem:[%s1131_s24 + $0x38] sm:$0xff] (%p2237_p11), %v1175_v1  }
 0x25c   : > { %v978_v23 = vpop.permute.xlu0 %977 }
 0x25d   : > { %1537 = vst.msk [vmem:[%s2445_s27 + $0x40] sm:$0xf] %vm888_vm0, %v978_v23 }
 0x25e   : > { %v980_v26 = vpop.permute.xlu1 %979 }
 0x25f   : > { %1538 = vst.msk [vmem:[%s2445_s27 + $0x44] sm:$0xf] %vm888_vm0, %v980_v26 }
 0x264   : > { %v982_v27 = vpop.permute.xlu1 %981 }
 0x265   : > { %1539 = vst.msk [vmem:[%s2445_s27 + $0x48] sm:$0xf] %vm888_vm0, %v982_v27 }
 0x266   : > { %v1179_v24 = vld [vmem:[%s2445_s27 + $0x40] sm:$0xff] (%p2237_p11)  }
 0x267   : > { %1180 = vst [vmem:[%s1131_s24 + $0x80] sm:$0xff] (%p2237_p11), %v1179_v24  }
 0x268   : > { %v984_v28 = vpop.permute.xlu1 %983 }
 0x269   : > { %1540 = vst.msk [vmem:[%s2445_s27 + $0x4c] sm:$0xf] %vm888_vm0, %v984_v28 }
 0x26c   : > { %v986_v29 = vpop.permute.xlu0 %985 }
 0x26d   : > { %1541 = vst.msk [vmem:[%s2445_s27 + $0x50] sm:$0xf] %vm888_vm0, %v986_v29 }
 0x26e   : > { %v988_v10 = vpop.permute.xlu1 %987 }
 0x26f   : > { %1542 = vst.msk [vmem:[%s2445_s27 + $0x54] sm:$0xf] %vm888_vm0, %v988_v10 }
 0x270   : > { %v1183_v25 = vld [vmem:[%s2445_s27 + $0x48] sm:$0xff] (%p2237_p11)  }
 0x271   : > { %1184 = vst [vmem:[%s1131_s24 + $0x88] sm:$0xff] (%p2237_p11), %v1183_v25  }
 0x274   : > { %v990_v30 = vpop.permute.xlu0 %989 }
 0x275   : > { %1543 = vst.msk [vmem:[%s2445_s27 + $0x58] sm:$0xf] %vm888_vm0, %v990_v30 }
 0x276   : > { %v992_v31 = vpop.permute.xlu1 %991  ;;  %v1187_v49 = vld [vmem:[%s2445_s27 + $0x50] sm:$0xff] (%p2237_p11)  }
 0x277   : > { %1544 = vst.msk [vmem:[%s2445_s27 + $0x5c] sm:$0xf] %vm888_vm0, %v992_v31  ;;  %1188 = vst [vmem:[%s1131_s24 + $0x90] sm:$0xff] (%p2237_p11), %v1187_v49  }
 0x27c   : > { %v994_v11 = vpop.permute.xlu0 %993 }
 0x27d   : > { %1545 = vst.msk [vmem:[%s2445_s27 + $0x60] sm:$0xf] %vm888_vm0, %v994_v11 }
 0x27e   : > { %v996_v32 = vpop.permute.xlu1 %995  ;;  %v1191_v50 = vld [vmem:[%s2445_s27 + $0x58] sm:$0xff] (%p2237_p11)  }
 0x27f   : > { %1546 = vst.msk [vmem:[%s2445_s27 + $0x64] sm:$0xf] %vm888_vm0, %v996_v32  ;;  %1192 = vst [vmem:[%s1131_s24 + $0x98] sm:$0xff] (%p2237_p11), %v1191_v50  }
 0x284   : > { %v998_v35 = vpop.permute.xlu0 %997 }
 0x285   : > { %1547 = vst.msk [vmem:[%s2445_s27 + $0x68] sm:$0xf] %vm888_vm0, %v998_v35 }
 0x286   : > { %v1000_v36 = vpop.permute.xlu1 %999  ;;  %v1195_v0 = vld [vmem:[%s2445_s27 + $0x60] sm:$0xff] (%p2237_p11)  }
 0x287   : > { %1548 = vst.msk [vmem:[%s2445_s27 + $0x6c] sm:$0xf] %vm888_vm0, %v1000_v36  ;;  %1196 = vst [vmem:[%s1131_s24 + $0xa0] sm:$0xff] (%p2237_p11), %v1195_v0  }
 0x28c   : > { %v1002_v37 = vpop.permute.xlu0 %1001 }
 0x28d   : > { %1549 = vst.msk [vmem:[%s2445_s27 + $0x70] sm:$0xf] %vm888_vm0, %v1002_v37 }
 0x28e   : > { %v1004_v38 = vpop.permute.xlu1 %1003  ;;  %v1199_v33 = vld [vmem:[%s2445_s27 + $0x68] sm:$0xff] (%p2237_p11)  }
 0x28f   : > { %1550 = vst.msk [vmem:[%s2445_s27 + $0x74] sm:$0xf] %vm888_vm0, %v1004_v38  ;;  %1200 = vst [vmem:[%s1131_s24 + $0xa8] sm:$0xff] (%p2237_p11), %v1199_v33  }
 0x291   : > { %1126 = sbr.rel (!%p2237_p11) target bundleno = 672 (0x2a0), region = 44 }
 0x294   : > { %v1006_v20 = vpop.permute.xlu0 %1005 }
 0x295   : > { %1551 = vst.msk [vmem:[%s2445_s27 + $0x78] sm:$0xf] %vm888_vm0, %v1006_v20 }
 0x296   : > { %v1008_v39 = vpop.permute.xlu1 %1007  ;;  %v1203_v34 = vld [vmem:[%s2445_s27 + $0x70] sm:$0xff] (%p2237_p11)  }
 0x297   : > { %1552 = vst.msk [vmem:[%s2445_s27 + $0x7c] sm:$0xf] %vm888_vm0, %v1008_v39  ;;  %1204 = vst [vmem:[%s1131_s24 + $0xb0] sm:$0xff] (%p2237_p11), %v1203_v34  }
 0x29e   : > { %v1207_v51 = vld [vmem:[%s2445_s27 + $0x78] sm:$0xff]  }
 0x29f   : > { %1208 = vst [vmem:[%s1131_s24 + $0xb8] sm:$0xff] %v1207_v51  }
 0x2a0 PF: > { %s1590_s26 = sshll.u32 %s2074_s18, 4  ;;  %s1591_s30 = sshll.u32 %s2078_s19, 6 }
 0x2a1   : > { %s1303_s5 = sadd.s32 %s1591_s30, %s1590_s26  ;;  %s1322_s20 = sshll.u32 %s2451_s7, 4  ;;  %s1323_s20 = int_to_ptr.vmem [resolvable:$true] %s1322_s20 }
 0x2a2   : > { %s1592_s9 = sshll.u32 %s1303_s5, 6  ;;  %s2100_s29 = smov 1024  }
 0x2a3   : > { %s1305_s27 = scalar_lea.hbm %s2624_s4, %s1592_s9  ;;  %1792 = sst [smem:[#allocation10]] (%p2237_p11), %s2100_s29 }
 0x2a4   : > { %s2101_s10 = smov 2048   ;;  %s2102_s28 = smov 16  }
 0x2a5   : > { %1793 = sst [smem:[#allocation10 + $0x1]] (%p2237_p11), %s2101_s10  ;;  %s2103_s18 = smov 64  }
 0x2a6   : > { %1794 = sst [smem:[#allocation10 + $0x2]] (%p2237_p11), %s2102_s28  ;;  %s2104_s19 = smov 4  }
 0x2a7   : > { %1795 = sst [smem:[#allocation10 + $0x3]] (%p2237_p11), %s2103_s18  ;;  %s2105_s7 = smov [#allocation9]  }
 0x2a8   : > { %1796 = sst [smem:[#allocation10 + $0x4]] (%p2237_p11), %s2103_s18  ;;  %s2106_s13 = smov 0  }
 0x2a9   : > { %1797 = sst [smem:[#allocation10 + $0x5]] (%p2237_p11), %s2104_s19 }
 0x2aa   : > { %1798 = dma.general (%p2237_p11), %s1323_s20, 2048, %s1305_s27, %s1120_s11, %s2105_s7, [#allocation10], %s2106_s13, 0  }
 0x2ab PF: > { %s2654_s12 = sld [smem:[#allocation14_spill]]  ;;  %s2655_s14 = sld [smem:[#allocation16_spill]] }
 0x2ac   : > { %p1815_p6 = scmp.ge.s32.totalorder %s2090_s22, 2 }
 0x2b1   : > { %s1357_s23 = sand.u32 1, %s2654_s12   ;;  %p2656_p8 = scmp.ne.s32.totalorder %s2655_s14, 0 }
 0x2b2   : > { %s1358_s24 = scalar_lea.sflag [#allocation4], %s1357_s23 }
 0x2b3   : > { %p1809_p10 = pnand %p1815_p6, %p2656_p8 }
 0x2b5   : > { %2057 = dma.done.wait (!%p1809_p10), %s1358_s24, 2048  }
 0x2b6   : > { %2059 = vsyncadd (!%p1809_p10), %s1358_s24, 4294965248  ;;  %s22_s22 = sadd.s32 1, %s2090_s22   ;;  %s2657_s18 = sld [smem:[#allocation15_spill]] }
 0x2b7   : > { %p19_p12 = scmp.ge.s32.totalorder %s22_s22, 6   ;;  %s2658_s20 = sld [smem:[#allocation17_spill]] }
 0x2b8   : > { %s2659_s6 = sld [smem:[#allocation18_spill]]  ;;  %s2660_s15 = smov %s2066_s16 }
 0x2b9   : > { %s2661_s16 = smov %s2070_s17  ;;  %s2662_s17 = smov %s2254_s2 }
 0x2ba   : > { %s2663_s19 = smov %s2086_s21  ;;  %21 = sbr.rel (!%p19_p12) target bundleno = 10 (0xa), region = 141 }
 0x2be   : > { %s2664_s21 = smov %s2659_s6 }
 0x2c1   :  { %1363 = vsyncpa [#allocation3], 1 }
 0x2c2   :  { %1365 = vsyncpa [#allocation3 + $0x1], 1 }
 0x2c3   :  { %1366 = vsyncpa [#allocation6], 1 }
 0x2c4   :  { %1367 = vsyncpa [#allocation4], 1 }
 0x2c5   :  { %1369 = vsyncpa [#allocation4 + $0x1], 1 }

</bundles_post_ra>
